<compile_context>
chip_gen: v7x
topology: tpu7x:2x2x1
jax: 0.10.0
libtpu: 0.0.40
codegen_flags: <defaults>
</compile_context>

<pallas_src>
import jax
import jax.numpy as jnp
from jax.experimental import pallas as pl
from jax.experimental.pallas import tpu as pltpu


def _hbm_copy_kernel(x_ref, o_ref, sem):
    # One direct HBM->HBM DMA of the entire array. No VMEM staging.
    cp = pltpu.make_async_copy(x_ref, o_ref, sem)
    cp.start()
    cp.wait()


def _materialized_copy(x: jax.Array) -> jax.Array:
    n_bytes = x.size * jnp.dtype(x.dtype).itemsize
    return pl.pallas_call(
        _hbm_copy_kernel,
        out_shape=jax.ShapeDtypeStruct(x.shape, x.dtype),
        in_specs=[pl.BlockSpec(memory_space=pl.ANY)],
        out_specs=pl.BlockSpec(memory_space=pl.ANY),
        scratch_shapes=[pltpu.SemaphoreType.DMA],
        cost_estimate=pl.CostEstimate(
            flops=0, transcendentals=0, bytes_accessed=2 * n_bytes
        ),
    )(x)


def reshape_unsqueeze1(x: jax.Array, materialize: bool = False) -> jax.Array:
    """Equivalent of torch.Tensor.unsqueeze(1).

    Default: metadata-only reshape (free in XLA, recommended).
    materialize=True: produce a fresh buffer via a single HBM->HBM DMA.
    """
    out = jnp.expand_dims(x, 1)  # metadata-only, free
    if not materialize:
        return out
    return _materialized_copy(out)


if __name__ == "__main__":
    key = jax.random.PRNGKey(0)
    B, C, H, W = 2, 4, 16, 16
    x = jax.random.normal(key, (B, C, H, W), dtype=jnp.float32)

    expected = jnp.expand_dims(x, 1)

    # Default (metadata-only) path.
    out_free = jax.block_until_ready(reshape_unsqueeze1(x))
    assert out_free.shape == (B, 1, C, H, W), out_free.shape
    assert out_free.dtype == x.dtype
    assert bool(jnp.array_equal(out_free, expected))

    # Materialized path: single HBM->HBM DMA via Pallas.
    out_copy = jax.block_until_ready(reshape_unsqueeze1(x, materialize=True))
    assert out_copy.shape == (B, 1, C, H, W), out_copy.shape
    assert out_copy.dtype == x.dtype
    assert bool(jnp.array_equal(out_copy, expected))

    # Also check an odd size that is NOT a multiple of 128 elements
    # (previously fell back silently; now handled by the direct DMA).
    x_odd = jax.random.normal(key, (3, 5, 7, 3), dtype=jnp.float32)
    out_odd = jax.block_until_ready(reshape_unsqueeze1(x_odd, materialize=True))
    assert out_odd.shape == (3, 1, 5, 7, 3), out_odd.shape
    assert bool(jnp.array_equal(out_odd, jnp.expand_dims(x_odd, 1)))

    print("KERNEL_OK")
</pallas_src>

<mosaic_0001>
module attributes {stable_mosaic.version = 11 : i64} {
  func.func @_hbm_copy_kernel(%arg0: memref<2x1x4x16x16xf32, #tpu.memory_space<any>>, %arg1: memref<2x1x4x16x16xf32, #tpu.memory_space<any>>, %arg2: memref<!tpu.dma_semaphore, #tpu.memory_space<semaphore_mem>>) attributes {dimension_semantics = [], scalar_prefetch = 0 : i64, scratch_operands = 1 : i64, tpu.core_type = #tpu.core_type<tc>} {
    tpu.enqueue_dma source(%arg0 : memref<2x1x4x16x16xf32, #tpu.memory_space<any>>) target(%arg1 : memref<2x1x4x16x16xf32, #tpu.memory_space<any>>) target_semaphore(%arg2 : memref<!tpu.dma_semaphore, #tpu.memory_space<semaphore_mem>>)
    tpu.wait_dma2 semaphore(%arg2 : memref<!tpu.dma_semaphore, #tpu.memory_space<semaphore_mem>>) src(%arg0 : memref<2x1x4x16x16xf32, #tpu.memory_space<any>>) dst(%arg1 : memref<2x1x4x16x16xf32, #tpu.memory_space<any>>)
    return
  }
}

</mosaic_0001>

<bundles_post_ra>
// kernel: tpu_custom_call.1
= control target key start
LH: loop header
LB: loop body
LE: loop exit
PB: predicated region body
PF: predicated region fallthrough
CT: control target
= control target key end

     0   :  { %s37_s6 = smov [#allocation2]   ;;  %s38_s7 = smov [#allocation3]   ;;  %s56_s0 = inlined_call_operand.hbm [shape: f32[2,1,4,16,16], index: 0, kind: input, shape index: {}]   ;;  %s57_s1 = inlined_call_operand.hbm [shape: f32[2,1,4,16,16], index: 1, kind: output, shape index: {}]  }
   0x1   :  { %s39_s8 = smov 0  }
   0x2   :  { %18 = dma.general %s56_s0, 2048, %s57_s1, %s37_s6, %s38_s7, [#allocation4], %s39_s8, 0  }
   0x3   :  { %35 = dma.done.wait [#allocation2], 2048 }
   0x4   :  { %36 = vsyncadd [#allocation2], 4294965248 }
   0x5   :  { %25 = vsyncmov [#allocation2] }
   0x8   :  { %s26_s13 = vpop.sfrf %25 }
   0x9   :  { %p31_p0 = scmp.ne.s32.totalorder %s26_s13, 0 }
   0xb   :  { %30 = shalt.err (%p31_p0)  }

</bundles_post_ra>
